<compile_context>
chip_gen: v7x
topology: tpu7x:2x2x1
jax: 0.10.0
libtpu: 0.0.40
codegen_flags: <defaults>
</compile_context>

<pallas_src>
import functools

import jax
import jax.numpy as jnp
from jax import lax
from jax.experimental import pallas as pl
from jax.experimental.pallas import tpu as pltpu


def _depth_conv_kernel(x_ref, w_ref, b_ref, out_ref, *, W, Cin, B, HWp):
    # x_ref:   (B, Cin, HWp)    B input images, spatial flattened (lane-dense)
    # w_ref:   (Cout, 9*Cin)    fused depthwise*pointwise weight, bf16
    # b_ref:   (Cout, 1)        fused bias, f32
    # out_ref: (B, Cout, HWp)   lane-dense output
    P = 128  # lane-tile zero halo placed around the flat image (lives in vregs only)

    # Column-edge masks generated in-kernel (no HBM mask input): a lane's left/right
    # neighbour is invalid for the kw=0 / kw=2 taps when it wraps to another row.
    col = lax.broadcasted_iota(jnp.int32, (1, HWp), 1) % W
    mask_l = (col >= 1).astype(jnp.float32)        # kw = 0 tap (w-1)
    mask_r = (col <= W - 2).astype(jnp.float32)    # kw = 2 tap (w+1)

    zeros = jnp.zeros((Cin, P), jnp.float32)
    cols = []
    for b in range(B):
        xb = x_ref[b].astype(jnp.float32)                        # (Cin, HWp)
        # Flat zero-padded image entirely in vregs: out-of-image vertical taps read
        # the zero halo (and the wrapper's zero tail for the bottom rows).
        xext = jnp.concatenate([zeros, xb, zeros], axis=-1)      # (Cin, HWp + 2P)
        pieces = []
        for kh in range(3):
            for kw in range(3):
                off = (kh - 1) * W + (kw - 1)
                piece = xext[:, P + off:P + off + HWp]           # (Cin, HWp)
                if kw == 0:
                    piece = piece * mask_l
                elif kw == 2:
                    piece = piece * mask_r
                # bf16 MXU operand; mask math stays f32 (no bf16 VALU on v5e)
                pieces.append(piece.astype(jnp.bfloat16))
        cols.append(jnp.concatenate(pieces, axis=0))             # (9*Cin, HWp) bf16
    # stack the B images' im2col side-by-side along the lane axis
    col_mat = cols[0] if B == 1 else jnp.concatenate(cols, axis=-1)   # (9*Cin, B*HWp)

    # Fused depthwise(3x3) + pointwise(1x1): one MXU matmul, f32 accumulation,
    # followed by a broadcast f32 bias add on the VPU.
    y = jnp.dot(w_ref[...], col_mat, preferred_element_type=jnp.float32)  # (Cout, B*HWp)
    y = y + b_ref[...]

    for b in range(B):
        out_ref[b] = y[:, b * HWp:(b + 1) * HWp].astype(out_ref.dtype)


def _pick_block_batch(N, HWp, target_lanes=1024, max_lanes=4096):
    """Images per grid step: amortize the ~0.35us per-step overhead (>= target_lanes
    per matmul when possible) while keeping >= 2 grid steps whenever N >= 2 so the
    "parallel" axis still gives both v7x TensorCores work."""
    best = 1
    for B in range(1, N + 1):
        if N % B:
            continue
        if N >= 2 and N // B < 2:
            continue
        if B * HWp > max_lanes:
            break
        best = B
        if B * HWp >= target_lanes:
            break
    return best


def depth_conv_forward(x, dw_weight, dw_bias, pw_weight, pw_bias):
    """Depth_conv forward.  x: (N, Cin, H, W) NCHW.  Returns (N, Cout, H, W)."""
    N, Cin, H, W = x.shape
    Cout = pw_weight.shape[0]
    HW = H * W
    # Lane-density guard: flat spatial axis padded to a multiple of 128 so every
    # in-kernel tensor and the output store stay full-lane (unmasked vst).
    HWp = pl.cdiv(HW, 128) * 128

    # ---- wrapper-side weight prep: fold both convs into one matmul ----
    dw_w = dw_weight.reshape(Cin, 9).astype(jnp.float32)      # taps k = kh*3 + kw
    pw_w = pw_weight.reshape(Cout, Cin).astype(jnp.float32)
    # Wf[o, k*Cin + c] = pw[o, c] * dw[c, k]
    w_fused = jnp.einsum("oc,ck->okc", pw_w, dw_w).reshape(Cout, 9 * Cin)
    w_fused = w_fused.astype(jnp.bfloat16)                    # native MXU operand dtype
    # effective bias: point(depth(x) + dw_b) + pw_b, added as an f32 epilogue
    b_fused = (pw_w @ dw_bias.astype(jnp.float32)
               + pw_bias.astype(jnp.float32)).reshape(Cout, 1)

    xf = x.reshape(N, Cin, HW)                                # free reshape (no copy)
    if HWp != HW:
        # zero tail = bottom-edge conv padding for the last image rows
        xf = jnp.pad(xf, ((0, 0), (0, 0), (0, HWp - HW)))

    B = _pick_block_batch(N, HWp)
    G = N // B

    kernel = functools.partial(_depth_conv_kernel, W=W, Cin=Cin, B=B, HWp=HWp)

    # Explicit VMEM budget (v7x: 64 MiB physical / 32 MiB default scoped).
    vmem_needed = (2 * B * Cin * HWp * 4 + 2 * B * Cout * HWp * 4
                   + 2 * (Cout * 9 * Cin * 2 + Cout * 4) + (2 << 20))
    vmem_limit = int(min(max(vmem_needed, 8 << 20), 64 << 20))

    out = pl.pallas_call(
        kernel,
        out_shape=jax.ShapeDtypeStruct((N, Cout, HWp), x.dtype),
        grid_spec=pltpu.PrefetchScalarGridSpec(
            num_scalar_prefetch=0,
            grid=(G,),
            in_specs=[
                pl.BlockSpec((B, Cin, HWp), lambda g: (g, 0, 0)),
                pl.BlockSpec((Cout, 9 * Cin), lambda g: (0, 0)),
                pl.BlockSpec((Cout, 1), lambda g: (0, 0)),
            ],
            out_specs=pl.BlockSpec((B, Cout, HWp), lambda g: (g, 0, 0)),
        ),
        compiler_params=pltpu.CompilerParams(
            dimension_semantics=("parallel",),
            vmem_limit_bytes=vmem_limit),
    )(xf, w_fused, b_fused)

    # drop the spatial pad (no-op when HWp == HW) and free reshape back to NCHW
    return out[:, :, :HW].reshape(N, Cout, H, W)


def _reference(x_nchw, dw_weight, dw_bias, pw_weight, pw_bias):
    """Pure-JAX reference using lax.conv_general_dilated (NCHW)."""
    Cin = x_nchw.shape[1]
    dw_out = lax.conv_general_dilated(
        x_nchw, dw_weight, window_strides=(1, 1), padding=((1, 1), (1, 1)),
        dimension_numbers=("NCHW", "OIHW", "NCHW"),
        feature_group_count=Cin)
    dw_out = dw_out + dw_bias[None, :, None, None]
    pw_out = lax.conv_general_dilated(
        dw_out, pw_weight, window_strides=(1, 1), padding=((0, 0), (0, 0)),
        dimension_numbers=("NCHW", "OIHW", "NCHW"))
    return pw_out + pw_bias[None, :, None, None]


if __name__ == "__main__":
    key = jax.random.PRNGKey(0)
    N, Cin, Cout, H, W = 2, 4, 8, 16, 16

    k1, k2, k3, k4, k5 = jax.random.split(key, 5)
    x = jax.random.normal(k1, (N, Cin, H, W), dtype=jnp.float32)
    # Deterministic synthetic parameters (shapes match nn.Conv2d in __init__).
    dw_weight = jax.random.normal(k2, (Cin, 1, 3, 3), dtype=jnp.float32) * 0.1
    dw_bias = jax.random.normal(k3, (Cin,), dtype=jnp.float32) * 0.1
    pw_weight = jax.random.normal(k4, (Cout, Cin, 1, 1), dtype=jnp.float32) * 0.1
    pw_bias = jax.random.normal(k5, (Cout,), dtype=jnp.float32) * 0.1

    out = depth_conv_forward(x, dw_weight, dw_bias, pw_weight, pw_bias)
    out = jax.block_until_ready(out)

    ref = _reference(x, dw_weight, dw_bias, pw_weight, pw_bias)
    assert out.shape == (N, Cout, H, W)
    # bf16 MXU operands with f32 accumulation -> slightly looser tolerance than f32.
    assert jnp.allclose(out, ref, atol=2e-2, rtol=2e-2), "mismatch vs reference"

    print("KERNEL_OK")
</pallas_src>

<mosaic_0001>
module attributes {stable_mosaic.version = 11 : i64} {
  func.func @_depth_conv_kernel(%arg0: i32, %arg1: memref<1x4x256xf32, #tpu.memory_space<vmem>>, %arg2: memref<8x36xbf16, #tpu.memory_space<vmem>>, %arg3: memref<8x1xf32, #tpu.memory_space<vmem>>, %arg4: memref<1x8x256xf32, #tpu.memory_space<vmem>>) attributes {dimension_semantics = [#tpu.dimension_semantics<parallel>], iteration_bounds = array<i64: 2>, scalar_prefetch = 0 : i64, scratch_operands = 0 : i64, tpu.core_type = #tpu.core_type<tc>, window_params = [{transform_indices = @transform_0, window_bounds = array<i64: 1, 4, 256>}, {pipeline_mode = #tpu.pipeline_mode<synchronous>, transform_indices = @transform_1, window_bounds = array<i64: 8, 36>}, {pipeline_mode = #tpu.pipeline_mode<synchronous>, transform_indices = @transform_2, window_bounds = array<i64: 8, 1>}, {transform_indices = @transform_3, window_bounds = array<i64: 1, 8, 256>}]} {
    %0 = tpu.iota {dimensions = array<i32: 1>} : vector<1x256xi32>
    %c16_i32 = arith.constant 16 : i32
    %c0_i32 = arith.constant 0 : i32
    %1 = arith.cmpi eq, %c16_i32, %c0_i32 : i32
    %c1_i32 = arith.constant 1 : i32
    %2 = arith.select %1, %c1_i32, %c16_i32 : i32
    %3 = vector.broadcast %2 : i32 to vector<1x256xi32>
    %4 = arith.remsi %0, %3 : vector<1x256xi32>
    %c0_i32_0 = arith.constant 0 : i32
    %5 = vector.broadcast %c0_i32_0 : i32 to vector<1x256xi32>
    %6 = arith.cmpi ne, %4, %5 : vector<1x256xi32>
    %c0_i32_1 = arith.constant 0 : i32
    %7 = vector.broadcast %c0_i32_1 : i32 to vector<1x256xi32>
    %8 = arith.cmpi slt, %4, %7 : vector<1x256xi32>
    %c0_i32_2 = arith.constant 0 : i32
    %9 = arith.cmpi slt, %2, %c0_i32_2 : i32
    %10 = vector.broadcast %9 : i1 to vector<1x256xi1>
    %11 = vector.broadcast %10 : vector<1x256xi1> to vector<1x256xi1>
    %12 = arith.xori %8, %11 : vector<1x256xi1>
    %13 = arith.andi %12, %6 : vector<1x256xi1>
    %14 = vector.broadcast %2 : i32 to vector<1x256xi32>
    %15 = arith.addi %4, %14 : vector<1x256xi32>
    %16 = arith.select %13, %15, %4 : vector<1x256xi1>, vector<1x256xi32>
    %c1_i32_3 = arith.constant 1 : i32
    %17 = vector.broadcast %c1_i32_3 : i32 to vector<1x256xi32>
    %18 = arith.cmpi sge, %16, %17 : vector<1x256xi32>
    %19 = arith.extui %18 : vector<1x256xi1> to vector<1x256xi32>
    %20 = arith.sitofp %19 : vector<1x256xi32> to vector<1x256xf32>
    %c14_i32 = arith.constant 14 : i32
    %21 = vector.broadcast %c14_i32 : i32 to vector<1x256xi32>
    %22 = arith.cmpi sle, %16, %21 : vector<1x256xi32>
    %23 = arith.extui %22 : vector<1x256xi1> to vector<1x256xi32>
    %24 = arith.sitofp %23 : vector<1x256xi32> to vector<1x256xf32>
    %cst = arith.constant 0.000000e+00 : f32
    %25 = vector.broadcast %cst : f32 to vector<4x128xf32>
    %c0 = arith.constant 0 : index
    %c0_4 = arith.constant 0 : index
    %c0_5 = arith.constant 0 : index
    %26 = vector.load %arg1[%c0, %c0_4, %c0_5] : memref<1x4x256xf32, #tpu.memory_space<vmem>>, vector<1x4x256xf32>
    %27 = vector.shape_cast %26 : vector<1x4x256xf32> to vector<4x256xf32>
    %28 = tpu.concatenate %25, %27, %25 in 1 : vector<4x128xf32>, vector<4x256xf32>, vector<4x128xf32> -> vector<4x512xf32>
    %29 = vector.extract_strided_slice %28 {offsets = [0, 111], sizes = [4, 256], strides = [1, 1]} : vector<4x512xf32> to vector<4x256xf32>
    %30 = vector.broadcast %20 : vector<1x256xf32> to vector<4x256xf32>
    %31 = arith.mulf %29, %30 : vector<4x256xf32>
    %32 = arith.truncf %31 : vector<4x256xf32> to vector<4x256xbf16>
    %33 = vector.extract_strided_slice %28 {offsets = [0, 112], sizes = [4, 256], strides = [1, 1]} : vector<4x512xf32> to vector<4x256xf32>
    %34 = arith.truncf %33 : vector<4x256xf32> to vector<4x256xbf16>
    %35 = vector.extract_strided_slice %28 {offsets = [0, 113], sizes = [4, 256], strides = [1, 1]} : vector<4x512xf32> to vector<4x256xf32>
    %36 = vector.broadcast %24 : vector<1x256xf32> to vector<4x256xf32>
    %37 = arith.mulf %35, %36 : vector<4x256xf32>
    %38 = arith.truncf %37 : vector<4x256xf32> to vector<4x256xbf16>
    %39 = vector.extract_strided_slice %28 {offsets = [0, 127], sizes = [4, 256], strides = [1, 1]} : vector<4x512xf32> to vector<4x256xf32>
    %40 = vector.broadcast %20 : vector<1x256xf32> to vector<4x256xf32>
    %41 = arith.mulf %39, %40 : vector<4x256xf32>
    %42 = arith.truncf %41 : vector<4x256xf32> to vector<4x256xbf16>
    %43 = vector.extract_strided_slice %28 {offsets = [0, 128], sizes = [4, 256], strides = [1, 1]} : vector<4x512xf32> to vector<4x256xf32>
    %44 = arith.truncf %43 : vector<4x256xf32> to vector<4x256xbf16>
    %45 = vector.extract_strided_slice %28 {offsets = [0, 129], sizes = [4, 256], strides = [1, 1]} : vector<4x512xf32> to vector<4x256xf32>
    %46 = vector.broadcast %24 : vector<1x256xf32> to vector<4x256xf32>
    %47 = arith.mulf %45, %46 : vector<4x256xf32>
    %48 = arith.truncf %47 : vector<4x256xf32> to vector<4x256xbf16>
    %49 = vector.extract_strided_slice %28 {offsets = [0, 143], sizes = [4, 256], strides = [1, 1]} : vector<4x512xf32> to vector<4x256xf32>
    %50 = vector.broadcast %20 : vector<1x256xf32> to vector<4x256xf32>
    %51 = arith.mulf %49, %50 : vector<4x256xf32>
    %52 = arith.truncf %51 : vector<4x256xf32> to vector<4x256xbf16>
    %53 = vector.extract_strided_slice %28 {offsets = [0, 144], sizes = [4, 256], strides = [1, 1]} : vector<4x512xf32> to vector<4x256xf32>
    %54 = arith.truncf %53 : vector<4x256xf32> to vector<4x256xbf16>
    %55 = vector.extract_strided_slice %28 {offsets = [0, 145], sizes = [4, 256], strides = [1, 1]} : vector<4x512xf32> to vector<4x256xf32>
    %56 = vector.broadcast %24 : vector<1x256xf32> to vector<4x256xf32>
    %57 = arith.mulf %55, %56 : vector<4x256xf32>
    %58 = arith.truncf %57 : vector<4x256xf32> to vector<4x256xbf16>
    %59 = tpu.concatenate %32, %34, %38, %42, %44, %48, %52, %54, %58 in 0 : vector<4x256xbf16>, vector<4x256xbf16>, vector<4x256xbf16>, vector<4x256xbf16>, vector<4x256xbf16>, vector<4x256xbf16>, vector<4x256xbf16>, vector<4x256xbf16>, vector<4x256xbf16> -> vector<36x256xbf16>
    %c0_6 = arith.constant 0 : index
    %c0_7 = arith.constant 0 : index
    %60 = vector.load %arg2[%c0_6, %c0_7] : memref<8x36xbf16, #tpu.memory_space<vmem>>, vector<8x36xbf16>
    %cst_8 = arith.constant dense<0.000000e+00> : vector<8x256xf32>
    %61 = tpu.matmul %60, %59, %cst_8 {dimension_numbers = #tpu.dot_dimension_numbers<[1], [0], [0], [1], [0, 0, 1, 1], [], []>} : vector<8x36xbf16>, vector<36x256xbf16>, vector<8x256xf32> -> vector<8x256xf32>
    %c0_9 = arith.constant 0 : index
    %c0_10 = arith.constant 0 : index
    %62 = vector.load %arg3[%c0_9, %c0_10] : memref<8x1xf32, #tpu.memory_space<vmem>>, vector<8x1xf32>
    %63 = vector.broadcast %62 : vector<8x1xf32> to vector<8x256xf32>
    %64 = arith.addf %61, %63 : vector<8x256xf32>
    %c0_11 = arith.constant 0 : index
    %c0_12 = arith.constant 0 : index
    %c0_13 = arith.constant 0 : index
    %65 = vector.load %arg4[%c0_11, %c0_12, %c0_13] : memref<1x8x256xf32, #tpu.memory_space<vmem>>, vector<1x8x256xf32>
    %66 = vector.shape_cast %65 : vector<1x8x256xf32> to vector<8x256xf32>
    %67 = vector.shape_cast %64 : vector<8x256xf32> to vector<1x8x256xf32>
    tpu.vector_store %arg4[%c0_11, %c0_12, %c0_13], %67 {strides = array<i32>} : memref<1x8x256xf32, #tpu.memory_space<vmem>>, vector<1x8x256xf32>,
    return
  }
  func.func @transform_0(%arg0: i32) -> (i32, i32, i32) {
    %c0_i32 = arith.constant 0 : i32
    %c0_i32_0 = arith.constant 0 : i32
    %c0_i32_1 = arith.constant 0 : i32
    return %arg0, %c0_i32, %c0_i32_0 : i32, i32, i32
  }
  func.func @transform_1(%arg0: i32) -> (i32, i32) {
    %c0_i32 = arith.constant 0 : i32
    %c0_i32_0 = arith.constant 0 : i32
    %c0_i32_1 = arith.constant 0 : i32
    return %c0_i32, %c0_i32_0 : i32, i32
  }
  func.func @transform_2(%arg0: i32) -> (i32, i32) {
    %c0_i32 = arith.constant 0 : i32
    %c0_i32_0 = arith.constant 0 : i32
    %c0_i32_1 = arith.constant 0 : i32
    return %c0_i32, %c0_i32_0 : i32, i32
  }
  func.func @transform_3(%arg0: i32) -> (i32, i32, i32) {
    %c0_i32 = arith.constant 0 : i32
    %c0_i32_0 = arith.constant 0 : i32
    %c0_i32_1 = arith.constant 0 : i32
    return %arg0, %c0_i32, %c0_i32_0 : i32, i32, i32
  }
}

</mosaic_0001>

<bundles_post_ra>
// kernel: tpu_custom_call.1
= control target key start
LH: loop header
LB: loop body
LE: loop exit
PB: predicated region body
PF: predicated region fallthrough
CT: control target
= control target key end

     0   :  { %8 = vsyncpa [#allocation3], 0  ;;  %s1172_s0 = inlined_call_operand.hbm [shape: f32[2,4,256], index: 0, kind: input, shape index: {}]   ;;  %s1173_s1 = inlined_call_operand.vmem [shape: bf16[8,36], index: 1, kind: input, shape index: {}]   ;;  %s1174_s2 = inlined_call_operand.vmem [shape: f32[8,1], index: 2, kind: input, shape index: {}]   ;;  %s1175_s3 = inlined_call_operand.hbm [shape: f32[2,8,256], index: 3, kind: output, shape index: {}]  }
   0x1   :  { %10 = vsyncpa [#allocation3 + $0x1], 0 }
   0x2   :  { %11 = vsyncpa [#allocation4], 0 }
   0x3   :  { %13 = vsyncpa [#allocation4 + $0x1], 0  ;;  %s908_s12 = smov 0   ;;  %s910_s13 = smov 0  }
   0x4   :  { %s912_s14 = smov 0   ;;  %s914_s15 = smov 0  }
   0x5 LB: > { %s929_s16 = sadd.s32 4294967295, %s869_s15   ;;  %s658_s17 = sadd.s32 4294967294, %s869_s15   ;;  %s869_s15 = sphi %s914_s15, %s1190_s15   ;;  %s865_s14 = sphi %s912_s14, %s1189_s14   ;;  %s861_s13 = sphi %s910_s13, %s1188_s13   ;;  %s857_s12 = sphi %s908_s12, %s1187_s12  }
   0x6   : > { %s933_s18 = sadd.s32 1, %s869_s15   ;;  %s26_s19 = sadd.s32 1, %s865_s14 }
   0x7   : > { %s23_s20 = ssub.s32 %s869_s15, %s933_s18  ;;  %p33_p0 = scmp.ne.s32.totalorder %s865_s14, %s861_s13 }
   0x8   : > { %p24_p1 = scmp.eq.s32.totalorder %s23_s20, 0  ;;  %p34_p2 = scmp.eq.s32.totalorder %s869_s15, 0 }
   0x9   : > { %p39_p3 = scmp.ne.s32.totalorder %s861_s13, %s857_s12  ;;  %p40_p4 = scmp.eq.s32.totalorder %s929_s16, 0 }
   0xa   : > { %s945_s21 = scalar_select %p24_p1, %s865_s14, %s26_s19  }
   0xb   : > { %p947_p5 = por %p34_p2, %p33_p0  ;;  %p951_p6 = por %p40_p4, %p39_p3 }
   0xc   : > { %p105_p7 = scmp.eq.s32.totalorder %s929_s16, 1  ;;  %p111_p8 = scmp.eq.s32.totalorder %s658_s17, 1 }
   0xd   : > { %p692_p10 = scmp.lt.s32.totalorder %s869_s15, 2  ;;  %s137_s26 = sand.u32 1, %s865_s14  }
   0xe   : > { %p958_p11 = por %p105_p7, %p33_p0  ;;  %p962_p12 = por %p111_p8, %p39_p3 }
   0xf   : > { %s678_s27 = sshll.u32 %s869_s15, 7  ;;  %s661_s28 = sshll.u32 %s137_s26, 3 }
  0x10   : > { %s1179_s24 = scalar_select %p958_p11, 1, 0 }
  0x11   : > { %s1180_s25 = scalar_select %p962_p12, 1, 0 }
  0x12   : > { %s971_s4 = scalar_lea.hbm %s1172_s0, %s678_s27  ;;  %s141_s5 = scalar_lea.vmem [#allocation2], %s661_s28 }
  0x13   : > { %s149_s6 = sshll.u32 %s141_s5, 4  ;;  %p975_p13 = pnand %p692_p10, %p947_p5  ;;  %s979_s6 = int_to_ptr.vmem [resolvable:$true] %s149_s6 }
  0x14   : > { %s138_s8 = scalar_lea.sflag [#allocation3], %s137_s26  ;;  %s773_s9 = scalar_lea.hbm %s971_s4, 128 }
  0x15   : > { %p774_p2 = scmp.ne.s32.totalorder %s971_s4, %s773_s9  ;;  %p775_p3 = pneg %p975_p13 }
  0x16   : > { %s778_s17 = scalar_lea.hbm %s1172_s0, 256  ;;  %p779_p5 = scmp.lt.u32.totalorder %s971_s4, %s1172_s0 }
  0x17   : > { %p776_p4 = pnand %p775_p3, %p774_p2  ;;  %p780_p8 = scmp.lt.u32.totalorder %s778_s17, %s773_s9 }
  0x18   : > { %p782_p9 = scmp.lt.u32.totalorder %s773_s9, %s971_s4 }
  0x19   : > { %p777_p7 = pneg %p776_p4  ;;  %p781_p10 = por %p780_p8, %p779_p5 }
  0x1b   : > { %p783_p0 = por %p782_p9, %p781_p10 }
  0x1d   : > { %p784_p1 = pnand %p783_p0, %p777_p7 }
  0x1f   : > { %787 = shalt.err (!%p784_p1)
}
  0x20   : > { %s788_s22 = scalar_lea.vmem %s979_s6, 128  ;;  %s871_s26 = smov [#allocation2]  }
  0x21   : > { %p789_p2 = scmp.ne.s32.totalorder %s979_s6, %s788_s22  ;;  %s793_s27 = sshll.u32 %s871_s26, 4  ;;  %s794_s27 = int_to_ptr.vmem [resolvable:$false] %s793_s27 }
  0x22   : > { %s795_s28 = scalar_lea.vmem %s794_s27, 256  ;;  %p796_p11 = scmp.lt.s32.totalorder %s979_s6, %s794_s27 }
  0x23   : > { %p791_p4 = pnand %p789_p2, %p775_p3  ;;  %p797_p5 = scmp.lt.s32.totalorder %s795_s28, %s788_s22 }
  0x25   : > { %p792_p12 = pneg %p791_p4  ;;  %p798_p8 = por %p797_p5, %p796_p11 }
  0x27   : > { %p799_p9 = pnand %p798_p8, %p792_p12 }
  0x29   : > { %802 = shalt.err (!%p799_p9)
}
  0x2a   : > { %687 = dma.hbm_to_vmem [thread:$0]  (!%p975_p13), %s971_s4, 128, %s979_s6, %s138_s8  }
  0x2b   : > { %p1182_p0 = scmp.lt.s32.totalorder %s869_s15, 3  ;;  %p1183_p1 = scmp.ge.s32.totalorder %s869_s15, 1 }
  0x2d   : > { %p155_p3 = pnand %p1183_p1, %p1182_p0 }
  0x2e   : > { %s1013_s29 = sand.u32 (!%p155_p3), 1, %s861_s13   ;;  %v188_v0 = vlaneseq (!%p155_p3) }
  0x2f   : > { %158 = sbr.rel (%p155_p3) target bundleno = 696 (0x2b8), region = 32  ;;  %s665_s30 = sshll.u32 (!%p155_p3), %s1013_s29, 3 }
  0x30   : > { %s161_s5 = scalar_lea.sflag (!%p155_p3), [#allocation3], %s1013_s29  ;;  %s164_s9 = scalar_lea.vmem (!%p155_p3), [#allocation2], %s665_s30 }
  0x36   : > { %848 = dma.done.wait (%p951_p6), %s161_s5, 128  }
  0x37   : > { %850 = vsyncadd (%p951_p6), %s161_s5, 4294967168  ;;  %v189_v1 = vand.u32 127, %v188_v0  ;;  %v872_v5 = vmov 0.0   ;;  %v1021_v11 = vld [vmem:[%s164_s9] sm:$0xff]  ;;  %s873_s4 = smov 113   ;;  %s874_s23 = smov 1  }
  0x38   : > { %v1025_v13 = vcombine.high %v1021_v11, %v1021_v11  ;;  %v249_v14 = vpack.c.bf16 %v1021_v11, %v1021_v11  ;;  %s875_s6 = smov 127   ;;  %s876_s7 = smov 15   ;;  %v879_v18 = vmov 0.0|0.0   ;;  %vm257_vm4 = vcmask 924672  }
  0x39   : > { %v190_v2 = vadd.s32 128, %v189_v1  ;;  %v195_v3 = vand.u32 15, %v189_v1  ;;  %s877_s8 = smov 17   ;;  %s878_s10 = smov 111   ;;  %v331_v19 = vrot.slane %v879_v18, 6  ;;  %vm302_vm5 = vcmask 121856  }
  0x3a   : > { %v250_v15 = vpack.c.bf16 %v1025_v13, %v1025_v13  ;;  %v332_v16 = vrot.slane %v249_v14, 6  ;;  %v409_v20 = vrot.slane %v249_v14, 2  ;;  %s880_s11 = smov 95   ;;  %s881_s17 = smov 126   ;;  %vm272_vm6 = vcmask 1039360  }
  0x3b   : > { %v202_v4 = vand.u32 15, %v190_v2  ;;  %vm221_vm0 = vcmp.le.s32.totalorder %v195_v3, 14  ;;  %vm215_vm1 = vcmp.ge.s32.totalorder %v195_v3, 1  ;;  %s882_s19 = smov 110   ;;  %s883_s20 = smov 112   ;;  %vm287_vm7 = vcmask 7168  }
  0x3c   : > { %v669_v6 = vsel %vm221_vm0, 1.0, %v872_v5  ;;  %v667_v8 = vsel %vm215_vm1, 1.0, %v872_v5  ;;  %v333_v17 = vrot.slane %v250_v15, 6  ;;  %v410_v21 = vrot.slane %v250_v15, 2  ;;  %s884_s22 = smov 96   ;;  %s885_s26 = smov 94  }
  0x3d   : > { %vm222_vm2 = vcmp.le.s32.totalorder %v202_v4, 14  ;;  %vm216_vm3 = vcmp.ge.s32.totalorder %v202_v4, 1  ;;  %vm317_vm8 = vcmask 138240   ;;  %vm443_vm9 = vcmask 1043456   ;;  %s666_s9 = sshll.u32 %s1013_s29, 4  ;;  %p1184_p11 = scmp.ne.s32.totalorder %s1179_s24, 0 }
  0x3e   : > { %v670_v7 = vsel %vm222_vm2, 1.0, %v872_v5  ;;  %v668_v9 = vsel %vm216_vm3, 1.0, %v872_v5  ;;  %vm433_vm10 = vcmask 1041408   ;;  %vm450_vm11 = vcmask 1045504  }
  0x3f   : > { %v741_v10 = vpack.i.bf16 %v670_v7, %v669_v6  ;;  %v746_v12 = vpack.i.bf16 %v668_v9, %v667_v8  ;;  %vm237_vm12 = vcmask 908288   ;;  %vm391_vm13 = vcmask 900096  }
  0x40   : > { %vm406_vm14 = vcmask 785408   ;;  %vm418_vm15 = vcmask 777216   ;;  %vm355_vm0 = vcmask 1031168   ;;  %vm370_vm1 = vcmask 916480  }
  0x41   : > { %742 = vrot.lane.b32.xlu0 %v741_v10, %s873_s4  ;;  %752 = vrot.lane.b32.xlu1 %v741_v10, %s874_s23  ;;  %vm430_vm2 = vcmask 769024   ;;  %vm520_vm3 = vcmask 293888   ;;  %s679_s4 = sshll.u32 %s929_s16, 8  ;;  %s186_s23 = scalar_lea.vmem [#allocation5], %s666_s9 }
  0x42   : > { %s574_s16 = scalar_lea.sflag [#allocation4], %s1013_s29 }
  0x45   : > { %747 = vrot.lane.b32.xlu0 %v746_v12, %s875_s6  ;;  %757 = vrot.lane.b32.xlu1 %v746_v12, %s876_s7 }
  0x49   : > { %762 = vrot.lane.b32.xlu0 %v741_v10, %s877_s8  ;;  %767 = vrot.lane.b32.xlu1 %v746_v12, %s878_s10 }
  0x4d   : > { %336 = vrot.lane.b32.xlu0 %v332_v16, %s875_s6  ;;  %338 = vrot.lane.b32.xlu1 %v333_v17, %s875_s6 }
  0x51   : > { %334 = vrot.lane.b32.xlu0 %v331_v19, %s875_s6  ;;  %373 = vrot.lane.b32.xlu1 %v249_v14, %s878_s10  ;;  %s588_s6 = sshll.u32 %s186_s23, 4  ;;  %s1130_s6 = int_to_ptr.vmem [resolvable:$true] %s588_s6 }
  0x55   : > { %375 = vrot.lane.b32.xlu0 %v250_v15, %s878_s10  ;;  %412 = vrot.lane.b32.xlu1 %v409_v20, %s880_s11  ;;  %v411_v15 = vrot.slane %v879_v18, 2  ;;  %s1128_s10 = scalar_lea.hbm %s1175_s3, %s679_s4 }
  0x59   : > { %414 = vrot.lane.b32.xlu0 %v410_v21, %s880_s11 }
  0xb3   : > { %v743_v22 = vpop.permute.xlu0 %742  ;;  %v753_v23 = vpop.permute.xlu1 %752 }
  0xb4   : > { %v744_v24 = vunpack.i.l.bf16 %v743_v22  ;;  %v754_v25 = vunpack.i.l.bf16 %v753_v23  ;;  %v755_v35 = vunpack.i.h.bf16 %v753_v23  ;;  %v745_v37 = vunpack.i.h.bf16 %v743_v22 }
  0xb6   : > { %v262_v26 = vmul.f32 0.0, %v744_v24  ;;  %v292_v27 = vmul.f32 %v754_v25, %v1021_v11  ;;  %v294_v44 = vmul.f32 0.0, %v755_v35  ;;  %v264_v46 = vmul.f32 %v745_v37, %v1025_v13 }
  0xb7   : > { %v748_v28 = vpop.permute.xlu0 %747  ;;  %v758_v29 = vpop.permute.xlu1 %757  ;;  %v258_v49 = vsel %vm257_vm4, %v744_v24, %v745_v37  ;;  %v288_v1 = vsel %vm287_vm7, %v754_v25, %v755_v35 }
  0xb8   : > { %v265_v30 = vpack.c.bf16 %v262_v26, %v262_v26  ;;  %v295_v31 = vpack.c.bf16 %v292_v27, %v292_v27  ;;  %v750_v32 = vunpack.i.h.bf16 %v748_v28  ;;  %v749_v33 = vunpack.i.l.bf16 %v748_v28 }
  0xb9   : > { %v759_v34 = vunpack.i.l.bf16 %v758_v29  ;;  %v760_v47 = vunpack.i.h.bf16 %v758_v29  ;;  %v297_v51 = vpack.c.bf16 %v294_v44, %v294_v44  ;;  %v263_v53 = vmul.f32 %v258_v49, %v1021_v11 }
  0xba   : > { %v346_v36 = vrot.slane %v265_v30, 4  ;;  %v277_v38 = vmul.f32 0.0, %v749_v33  ;;  %v279_v39 = vmul.f32 %v750_v32, %v1025_v13  ;;  %v382_v41 = vrot.slane %v295_v31, 6 }
  0xbb   : > { %v307_v40 = vmul.f32 %v759_v34, %v1021_v11  ;;  %v267_v54 = vpack.c.bf16 %v264_v46, %v264_v46  ;;  %v309_v55 = vmul.f32 0.0, %v760_v47  ;;  %v303_v56 = vsel %vm302_vm5, %v759_v34, %v760_v47  ;;  %v763_v60 = vpop.permute.xlu0 %762  ;;  %v768_v18 = vpop.permute.xlu1 %767 }
  0xbc   : > { %349 = vrot.lane.b32.xlu1 %v346_v36, %s881_s17  ;;  %v280_v42 = vpack.c.bf16 %v277_v38, %v277_v38  ;;  %v282_v45 = vpack.c.bf16 %v279_v39, %v279_v39  ;;  %v273_v57 = vsel %vm272_vm6, %v749_v33, %v750_v32  ;;  %v384_v58 = vrot.slane %v297_v51, 6 }
  0xbd   : > { %v310_v43 = vpack.c.bf16 %v307_v40, %v307_v40  ;;  %v266_v59 = vpack.c.bf16 %v263_v53, %v263_v53  ;;  %v308_v61 = vmul.f32 %v303_v56, %v1025_v13  ;;  %v312_v62 = vpack.c.bf16 %v309_v55, %v309_v55 }
  0xbe   : > { %v361_v48 = vrot.slane %v280_v42, 2  ;;  %v363_v52 = vrot.slane %v282_v45, 2  ;;  %v348_v63 = vrot.slane %v267_v54, 4  ;;  %v278_v0 = vmul.f32 %v273_v57, %v1021_v11 }
  0xbf   : > { %v397_v50 = vrot.slane %v310_v43, 4  ;;  %v765_v2 = vunpack.i.h.bf16 %v763_v60  ;;  %v764_v3 = vunpack.i.l.bf16 %v763_v60  ;;  %v347_v4 = vrot.slane %v266_v59, 4  ;;  %v339_v24 = vpop.permute.xlu1 %338  ;;  %v337_v25 = vpop.permute.xlu0 %336 }
  0xc0   : > { %385 = vrot.lane.b32.xlu1 %v382_v41, %s882_s19  ;;  %364 = vrot.lane.b32.xlu0 %v361_v48, %s883_s20  ;;  %v311_v5 = vpack.c.bf16 %v308_v61, %v308_v61  ;;  %v399_v6 = vrot.slane %v312_v62, 4  ;;  %v281_v7 = vpack.c.bf16 %v278_v0, %v278_v0  ;;  %v293_v8 = vmul.f32 %v288_v1, %v1025_v13 }
  0xc1   : > { %v318_v9 = vsel %vm317_vm8, %v764_v3, %v765_v2  ;;  %v322_v17 = vmul.f32 %v764_v3, %v1021_v11  ;;  %v324_v22 = vmul.f32 0.0, %v765_v2  ;;  %v770_v32 = vunpack.i.h.bf16 %v768_v18 }
  0xc2   : > { %v398_v10 = vrot.slane %v311_v5, 4  ;;  %v362_v12 = vrot.slane %v281_v7, 2  ;;  %v296_v14 = vpack.c.bf16 %v293_v8, %v293_v8  ;;  %v323_v16 = vmul.f32 %v318_v9, %v1025_v13 }
  0xc3   : > { %v325_v21 = vpack.c.bf16 %v322_v17, %v322_v17  ;;  %v327_v23 = vpack.c.bf16 %v324_v22, %v324_v22  ;;  %v374_v26 = vpop.permute.xlu1 %373  ;;  %v335_v27 = vpop.permute.xlu0 %334  ;;  %v244_v34 = vmul.f32 %v770_v32, %v1025_v13  ;;  %v769_v46 = vunpack.i.l.bf16 %v768_v18 }
  0xc4   : > { %368 = vrot.lane.b32.xlu1 %v363_v52, %s883_s20  ;;  %400 = vrot.lane.b32.xlu0 %v397_v50, %s884_s22  ;;  %v383_v19 = vrot.slane %v296_v14, 6  ;;  %v326_v20 = vpack.c.bf16 %v323_v16, %v323_v16  ;;  %v342_v61 = vsel %vm272_vm6, %v337_v25, %v339_v24 }
  0xc5   : > { %v247_v37 = vpack.c.bf16 %v244_v34, %v244_v34  ;;  %v238_v49 = vsel %vm237_vm12, %v769_v46, %v770_v32  ;;  %v242_v55 = vmul.f32 0.0, %v769_v46 }
  0xc6   : > { %v243_v52 = vmul.f32 %v238_v49, %v1021_v11 }
  0xc7   : > { %v1058_v28 = vpop.permute.xlu0 %375  ;;  %v413_v29 = vpop.permute.xlu1 %412  ;;  %v442_v43 = vsel %vm433_vm10, %v247_v37, %v339_v24 }
  0xc8   : > { %389 = vrot.lane.b32.xlu1 %v384_v58, %s882_s19  ;;  %353 = vrot.lane.b32.xlu0 %v348_v63, %s881_s17  ;;  %v378_v56 = vsel %vm237_vm12, %v374_v26, %v1058_v28  ;;  %v246_v58 = vpack.c.bf16 %v243_v52, %v243_v52 }
  0xca   : > { %v439_v5 = vsel %vm433_vm10, %v246_v58, %v342_v61 }
  0xcb   : > { %v1060_v30 = vpop.permute.xlu0 %414 }
  0xcc   : > { %351 = vrot.lane.b32.xlu1 %v347_v4, %s881_s17  ;;  %404 = vrot.lane.b32.xlu0 %v399_v6, %s884_s22  ;;  %v419_v11 = vsel %vm418_vm15, %v413_v29, %v1060_v30  ;;  %v245_v4 = vpack.c.bf16 %v242_v55, %v242_v55  ;;  %v341_v6 = vsel %vm272_vm6, %v335_v27, %v337_v25  ;;  %s887_s17 = smov [#allocation5]  }
  0xd0   : > { %402 = vrot.lane.b32.xlu1 %v398_v10, %s884_s22  ;;  %366 = vrot.lane.b32.xlu0 %v362_v12, %s883_s20 }
  0xd4   : > { %416 = vrot.lane.b32.xlu1 %v411_v15, %s880_s11  ;;  %387 = vrot.lane.b32.xlu0 %v383_v19, %s882_s19  ;;  %v436_v15 = vsel %vm433_vm10, %v245_v4, %v341_v6  ;;  %v886_v19 = vmov 0   ;;  %s803_s11 = scalar_lea.vmem %s1130_s6, 256  ;;  %s807_s19 = sshll.u32 %s887_s17, 4  ;;  %s808_s19 = int_to_ptr.vmem [resolvable:$false] %s807_s19 }
  0xd5   : > { %562 = vmatprep.mubr.bf16.mxu0 %v886_v19  ;;  %771 = vset.pattern.permute.xlu0 %v886_v19  ;;  %p804_p6 = scmp.ne.s32.totalorder %s1130_s6, %s803_s11  ;;  %s809_s20 = scalar_lea.vmem %s808_s19, 512 }
  0xd6   : > { %p810_p7 = scmp.lt.s32.totalorder %s1130_s6, %s808_s19  ;;  %p811_p10 = scmp.lt.s32.totalorder %s809_s20, %s803_s11 }
  0xd7   : > { %p805_p12 = pnand %p804_p6, %p1184_p11 }
  0xd8   : > { %426 = vrot.lane.b32.xlu1 %v326_v20, %s885_s26  ;;  %424 = vrot.lane.b32.xlu0 %v325_v21, %s885_s26  ;;  %p812_p2 = por %p811_p10, %p810_p7 }
  0xd9   : > { %p806_p13 = pneg %p805_p12 }
  0xdb   : > { %p813_p4 = pnand %p812_p2, %p806_p13 }
  0xdc   : > { %428 = vrot.lane.b32.xlu0 %v327_v23, %s885_s26  ;;  %v479_v23 = vld [vmem:[%s1174_s2] sm:$0xff] }
 0x12e   : > { %v350_v31 = vpop.permute.xlu1 %349 }
 0x132   : > { %v386_v33 = vpop.permute.xlu1 %385  ;;  %v365_v35 = vpop.permute.xlu0 %364 }
 0x133   : > { %v459_v38 = vsel %vm433_vm10, %v374_v26, %v386_v33 }
 0x136   : > { %v369_v36 = vpop.permute.xlu1 %368  ;;  %v401_v39 = vpop.permute.xlu0 %400 }
 0x137   : > { %v467_v40 = vsel %vm443_vm9, %v459_v38, %v401_v39 }
 0x138   : > { %v473_v41 = vsel %vm450_vm11, %v467_v40, %v413_v29 }
 0x139   : > { %497 = vrot.lane.b32.xlu0 %v473_v41, %s877_s8 }
 0x13a   : > { %v390_v42 = vpop.permute.xlu1 %389  ;;  %v354_v44 = vpop.permute.xlu0 %353 }
 0x13b   : > { %v449_v13 = vsel %vm443_vm9, %v442_v43, %v354_v44  ;;  %v478_v43 = vld [vmem:[%s1173_s1] sm:$0xf] }
 0x13c   : > { %v456_v45 = vsel %vm450_vm11, %v449_v13, %v369_v36 }
 0x13d   : > { %495 = vrot.lane.b32.xlu0 %v456_v45, %s877_s8 }
 0x13e   : > { %v352_v47 = vpop.permute.xlu1 %351  ;;  %v405_v48 = vpop.permute.xlu0 %404 }
 0x13f   : > { %v357_v63 = vsel %vm355_vm0, %v352_v47, %v354_v44  ;;  %v356_v9 = vsel %vm355_vm0, %v350_v31, %v352_v47 }
 0x140   : > { %v447_v8 = vsel %vm443_vm9, %v439_v5, %v357_v63  ;;  %v445_v17 = vsel %vm443_vm9, %v436_v15, %v356_v9 }
 0x142   : > { %v403_v50 = vpop.permute.xlu1 %402  ;;  %v367_v51 = vpop.permute.xlu0 %366 }
 0x143   : > { %v407_v59 = vsel %vm406_vm14, %v401_v39, %v403_v50  ;;  %v372_v2 = vsel %vm370_vm1, %v367_v51, %v369_v36  ;;  %v371_v14 = vsel %vm370_vm1, %v365_v35, %v367_v51  ;;  %v408_v20 = vsel %vm406_vm14, %v403_v50, %v405_v48 }
 0x144   : > { %v454_v10 = vsel %vm450_vm11, %v447_v8, %v372_v2  ;;  %v452_v21 = vsel %vm450_vm11, %v445_v17, %v371_v14 }
 0x146   : > { %v417_v53 = vpop.permute.xlu1 %416  ;;  %v388_v54 = vpop.permute.xlu0 %387 }
 0x147   : > { %v392_v57 = vsel %vm391_vm13, %v386_v33, %v388_v54  ;;  %v393_v7 = vsel %vm391_vm13, %v388_v54, %v390_v42  ;;  %v420_v18 = vsel %vm418_vm15, %v1060_v30, %v417_v53 }
 0x148   : > { %v462_v60 = vsel %vm433_vm10, %v378_v56, %v392_v57  ;;  %v465_v16 = vsel %vm433_vm10, %v1058_v28, %v393_v7 }
 0x149   : > { %v469_v62 = vsel %vm443_vm9, %v462_v60, %v407_v59  ;;  %v471_v22 = vsel %vm443_vm9, %v465_v16, %v408_v20 }
 0x14a   : > { %v425_v0 = vpop.permute.xlu0 %424  ;;  %v475_v1 = vsel %vm450_vm11, %v469_v62, %v419_v11  ;;  %v427_v3 = vpop.permute.xlu1 %426  ;;  %v477_v24 = vsel %vm450_vm11, %v471_v22, %v420_v18 }
 0x14b   : > { %503 = vrot.lane.b32.xlu1 %v425_v0, %s877_s8  ;;  %499 = vrot.lane.b32.xlu0 %v475_v1, %s877_s8  ;;  %v431_v12 = vsel %vm430_vm2, %v425_v0, %v427_v3 }
 0x14e   : > { %v429_v25 = vpop.permute.xlu0 %428 }
 0x14f   : > { %493 = vrot.lane.b32.xlu1 %v454_v10, %s877_s8  ;;  %505 = vrot.lane.b32.xlu0 %v431_v12, %s877_s8  ;;  %v432_v26 = vsel %vm430_vm2, %v427_v3, %v429_v25 }
 0x153   : > { %491 = vrot.lane.b32.xlu1 %v452_v21, %s877_s8  ;;  %482 = vperm.xlu0 %771, %v479_v23  }
 0x157   : > { %501 = vrot.lane.b32.xlu1 %v477_v24, %s877_s8 }
 0x15b   : > { %507 = vrot.lane.b32.xlu1 %v432_v26, %s877_s8 }
 0x1ab   : > { %v498_v27 = vpop.permute.xlu0 %497 }
 0x1af   : > { %v496_v29 = vpop.permute.xlu0 %495 }
 0x1bd   : > { %v504_v28 = vpop.permute.xlu1 %503  ;;  %v500_v33 = vpop.permute.xlu0 %499 }
 0x1be   : > { %v512_v38 = vsel %vm317_vm8, %v498_v27, %v500_v33 }
 0x1c1   : > { %v494_v31 = vpop.permute.xlu1 %493  ;;  %v506_v35 = vpop.permute.xlu0 %505 }
 0x1c2   : > { %v511_v32 = vsel %vm317_vm8, %v494_v31, %v496_v29  ;;  %v514_v39 = vsel %vm317_vm8, %v504_v28, %v506_v35 }
 0x1c3   : > { %530 = vmatprep.subr.bf16.mxu0 %v511_v32  ;;  %v525_v42 = vsel %vm433_vm10, %v514_v39, 0 }
 0x1c5   : > { %v492_v34 = vpop.permute.xlu1 %491 }
 0x1c6   : > { %v510_v30 = vsel %vm317_vm8, %v492_v34, %v494_v31 }
 0x1c7   : > { %531 = vmatpush1.bf16.msra.mxu0 %v510_v30 }
 0x1c9   : > { %v502_v36 = vpop.permute.xlu1 %501 }
 0x1ca   : > { %v513_v37 = vsel %vm317_vm8, %v500_v33, %v502_v36 }
 0x1cb   : > { %532 = vmatprep.subr.bf16.mxu0 %v513_v37 }
 0x1cc   : > { %533 = vmatpush1.bf16.msra.mxu0 %v512_v38 }
 0x1cd   : > { %v508_v40 = vpop.permute.xlu1 %507 }
 0x1ce   : > { %v515_v41 = vsel %vm317_vm8, %v506_v35, %v508_v40 }
 0x1cf   : > { %671 = vmatprep.subr.msk.bf16.mxu0 %vm433_vm10, %v515_v41 }
 0x1d0   : > { %535 = vmatpush1.bf16.msra.mxu0 %v525_v42 }
 0x1d2   : > { %v483_v44 = vpop.permute.xlu0 %482 }
 0x1d3   : > { %672 = vmatmul.mubr.msk.bf16.vlgmr.msra.gmra.mrb[0].mxu0 %vm520_vm3, %v478_v43 }
 0x2a6   : > { %v564_v13 = vpop.f32.mrb[0].mxu0 }
 0x2a7   : > { %v565_v45 = vadd.f32 %v564_v13, %v483_v44  ;;  %v566_v46 = vpop.f32.mrb[1].mxu0 }
 0x2a8   : > { %v567_v47 = vadd.f32 %v566_v46, %v483_v44  ;;  %v568_v48 = vpop.f32.mrb[2].mxu0 }
 0x2a9   : > { %571 = vst [vmem:[%s186_s23] sm:$0xff] %v565_v45  ;;  %v569_v49 = vpop.f32.mrb[3].mxu0 }
 0x2aa   : > { %572 = vst [vmem:[%s186_s23 + $0x8] sm:$0xff] %v567_v47 }
 0x2ab   : > { %816 = shalt.err (!%p813_p4)
}
 0x2ac   : > { %s817_s29 = scalar_lea.hbm %s1128_s10, 256  ;;  %s821_s27 = scalar_lea.hbm %s1175_s3, 512 }
 0x2ad   : > { %p818_p5 = scmp.ne.s32.totalorder %s1128_s10, %s817_s29  ;;  %p822_p0 = scmp.lt.u32.totalorder %s1128_s10, %s1175_s3 }
 0x2ae   : > { %p823_p1 = scmp.lt.u32.totalorder %s821_s27, %s817_s29  ;;  %p825_p6 = scmp.lt.u32.totalorder %s817_s29, %s1128_s10 }
 0x2af   : > { %p819_p8 = pnand %p818_p5, %p1184_p11 }
 0x2b0   : > { %p824_p3 = por %p823_p1, %p822_p0 }
 0x2b1   : > { %p820_p9 = pneg %p819_p8 }
 0x2b2   : > { %p826_p12 = por %p825_p6, %p824_p3 }
 0x2b4   : > { %p827_p13 = pnand %p826_p12, %p820_p9 }
 0x2b6   : > { %830 = shalt.err (!%p827_p13)
}
 0x2b7   : > { %682 = dma.vmem_to_hbm [thread:$0]  (%p1184_p11), %s1130_s6, 256, %s1128_s10, %s574_s16  }
 0x2b8 PF: > { %s600_s5 = sand.u32 1, %s857_s12   ;;  %p1185_p7 = scmp.ne.s32.totalorder %s1180_s25, 0 }
 0x2b9   : > { %p1186_p10 = scmp.ge.s32.totalorder %s869_s15, 2  ;;  %s601_s9 = scalar_lea.sflag [#allocation4], %s600_s5 }
 0x2bb   : > { %p689_p2 = pnand %p1186_p10, %p1185_p7 }
 0x2bd   : > { %852 = dma.done.wait (!%p689_p2), %s601_s9, 256  }
 0x2be   : > { %854 = vsyncadd (!%p689_p2), %s601_s9, 4294967040  ;;  %p16_p4 = scmp.ge.s32.totalorder %s933_s18, 4   ;;  %s1187_s12 = smov %s861_s13 }
 0x2bf   : > { %s1188_s13 = smov %s865_s14  ;;  %s1189_s14 = smov %s945_s21 }
 0x2c0   : > { %s1190_s15 = smov %s933_s18  ;;  %18 = sbr.rel (!%p16_p4) target bundleno = 5 (0x5), region = 77 }
 0x2c7   :  { %606 = vsyncpa [#allocation3], 1 }
 0x2c8   :  { %608 = vsyncpa [#allocation3 + $0x1], 1 }
 0x2c9   :  { %609 = vsyncpa [#allocation4], 1 }
 0x2ca   :  { %611 = vsyncpa [#allocation4 + $0x1], 1 }

</bundles_post_ra>
